<compile_context>
chip_gen: v7x
topology: tpu7x:2x2x1
jax: 0.10.0
libtpu: 0.0.40
codegen_flags: <defaults>
</compile_context>

<pallas_src>
import functools

import jax
import jax.numpy as jnp
from jax import lax
from jax.experimental import pallas as pl
from jax.experimental.pallas import tpu as pltpu

LN_EPS = 1e-5
BN_EPS = 1e-5
_HIGH = jax.lax.Precision.HIGHEST

# Set to jnp.bfloat16 on v6e/v7x to use the bf16 MXU rate (accumulation and
# softmax/LayerNorm statistics stay f32).  f32 here keeps the demo's check
# against the f32 reference strict.
DEFAULT_COMPUTE_DTYPE = jnp.float32


def _replicated_spec(arr):
    """Full-array block re-used (broadcast) by every grid step (weights/biases)."""
    n = arr.ndim
    return pl.BlockSpec(tuple(arr.shape), lambda *_, n=n: (0,) * n)


def _row_tile(m):
    """Row-tile for flattened (rows, channels) problems (feedback: 512 -> 2048)."""
    return m if m <= 2048 else 2048


# ----------------------------------------------------------------------------
# PositionEmbeddingLearned: Conv1d(k=1) -> BN1d -> ReLU -> Conv1d(k=1)
# BN (running stats) + conv1 bias pre-folded into w1f/b1f; rows flattened.
# The "_add" variant also adds a base stream (key features) so cross-attention
# consumes a single fused kv tensor.
# ----------------------------------------------------------------------------
def _pos_mlp(x, w1, b1, w2, b2, compute_dtype):
    h = jnp.dot(x.astype(compute_dtype), w1.astype(compute_dtype),
                preferred_element_type=jnp.float32)
    h = jnp.maximum(h + b1, 0.0)
    return jnp.dot(h.astype(compute_dtype), w2.astype(compute_dtype),
                   preferred_element_type=jnp.float32) + b2


def pos_mlp_kernel(x_ref, w1_ref, b1_ref, w2_ref, b2_ref, out_ref, *,
                   compute_dtype):
    y = _pos_mlp(x_ref[...], w1_ref[...], b1_ref[...], w2_ref[...], b2_ref[...],
                 compute_dtype)
    out_ref[...] = y.astype(out_ref.dtype)


def pos_mlp_add_kernel(x_ref, base_ref, w1_ref, b1_ref, w2_ref, b2_ref, out_ref,
                       *, compute_dtype):
    y = _pos_mlp(x_ref[...], w1_ref[...], b1_ref[...], w2_ref[...], b2_ref[...],
                 compute_dtype)
    out_ref[...] = (base_ref[...] + y).astype(out_ref.dtype)


def pos_embed(pos, p, compute_dtype=DEFAULT_COMPUTE_DTYPE):
    """MLP(pos) -> (B, N, E), channels-last (d_model on lanes)."""
    B, N, C = pos.shape
    E = p["w1f"].shape[1]
    M = B * N
    x = pos.reshape(M, C)
    tm = _row_tile(M)
    cost = pl.CostEstimate(
        flops=2 * M * E * (C + E), transcendentals=0,
        bytes_accessed=4 * (M * C + M * E + C * E + E * E + 2 * E))
    kern = functools.partial(pos_mlp_kernel, compute_dtype=compute_dtype)
    out = pl.pallas_call(
        kern,
        out_shape=jax.ShapeDtypeStruct((M, E), pos.dtype),
        grid_spec=pltpu.PrefetchScalarGridSpec(
            num_scalar_prefetch=0,
            grid=(pl.cdiv(M, tm),),
            in_specs=[
                pl.BlockSpec((tm, C), lambda i: (i, 0)),
                _replicated_spec(p["w1f"]), _replicated_spec(p["b1f"]),
                _replicated_spec(p["w2"]), _replicated_spec(p["b2"]),
            ],
            out_specs=pl.BlockSpec((tm, E), lambda i: (i, 0)),
        ),
        compiler_params=pltpu.CompilerParams(
            dimension_semantics=("parallel",),
            vmem_limit_bytes=32 * 1024 * 1024),
        cost_estimate=cost,
    )(x, p["w1f"], p["b1f"], p["w2"], p["b2"])
    return out.reshape(B, N, E)


def pos_embed_add(pos, base, p, compute_dtype=DEFAULT_COMPUTE_DTYPE):
    """base + MLP(pos): fuses key + key_pos_embed so cross-attn reads one kv."""
    B, N, C = pos.shape
    E = base.shape[-1]
    M = B * N
    x = pos.reshape(M, C)
    bflat = base.reshape(M, E)
    tm = _row_tile(M)
    cost = pl.CostEstimate(
        flops=2 * M * E * (C + E) + M * E, transcendentals=0,
        bytes_accessed=4 * (M * C + 2 * M * E + C * E + E * E + 2 * E))
    kern = functools.partial(pos_mlp_add_kernel, compute_dtype=compute_dtype)
    out = pl.pallas_call(
        kern,
        out_shape=jax.ShapeDtypeStruct((M, E), base.dtype),
        grid_spec=pltpu.PrefetchScalarGridSpec(
            num_scalar_prefetch=0,
            grid=(pl.cdiv(M, tm),),
            in_specs=[
                pl.BlockSpec((tm, C), lambda i: (i, 0)),
                pl.BlockSpec((tm, E), lambda i: (i, 0)),
                _replicated_spec(p["w1f"]), _replicated_spec(p["b1f"]),
                _replicated_spec(p["w2"]), _replicated_spec(p["b2"]),
            ],
            out_specs=pl.BlockSpec((tm, E), lambda i: (i, 0)),
        ),
        compiler_params=pltpu.CompilerParams(
            dimension_semantics=("parallel",),
            vmem_limit_bytes=32 * 1024 * 1024),
        cost_estimate=cost,
    )(x, bflat, p["w1f"], p["b1f"], p["w2"], p["b2"])
    return out.reshape(B, N, E)


# ----------------------------------------------------------------------------
# Fused MultiheadAttention sublayer with online softmax over kv tiles:
#   q projection (scale folded), fused k|v projection per kv tile, per-head
#   running max/sum/context in VMEM scratch, single full-E out-projection,
#   residual add and LayerNorm.  Grid = (B, q-tiles, kv-tiles).
# ----------------------------------------------------------------------------
def mha_ln_kernel(qx_ref, qin_ref, kv_ref,
                  wq_ref, bq_ref, wkv_ref, bkv_ref, wo_ref, bo_ref,
                  g_ref, beta_ref, out_ref,
                  q_sc, m_sc, l_sc, acc_sc,
                  *, num_heads, lk_total, block_k, compute_dtype):
    kv_i = pl.program_id(2)
    E = qx_ref.shape[-1]
    hd = E // num_heads
    needs_mask = (lk_total % block_k) != 0   # static

    @pl.when(kv_i == 0)
    def _init():
        # q projection once per (b, q-tile); 1/sqrt(hd) already folded in wq/bq.
        q = jnp.dot(qin_ref[0].astype(compute_dtype),
                    wq_ref[...].astype(compute_dtype),
                    preferred_element_type=jnp.float32) + bq_ref[...]
        q_sc[...] = q
        m_sc[...] = jnp.full_like(m_sc, -jnp.inf)
        l_sc[...] = jnp.zeros_like(l_sc)
        acc_sc[...] = jnp.zeros_like(acc_sc)

    # fused k|v projection for this kv tile
    kv = kv_ref[0]                                                 # (tk, E)
    if needs_mask:
        # zero padded kv rows so padded-lane garbage can never reach acc (0*NaN).
        row = lax.broadcasted_iota(jnp.int32, (block_k, 1), 0)
        kv = jnp.where(kv_i * block_k + row < lk_total, kv, 0.0)
    kvp = jnp.dot(kv.astype(compute_dtype), wkv_ref[...].astype(compute_dtype),
                  preferred_element_type=jnp.float32) + bkv_ref[...]   # (tk, 2E)
    kt = kvp[:, :E].astype(compute_dtype).T                        # (E, tk), one relayout
    v = kvp[:, E:].astype(compute_dtype)                           # (tk, E)
    q = q_sc[...]

    if needs_mask:
        col = lax.broadcasted_iota(jnp.int32, (1, block_k), 1)
        score_ok = kv_i * block_k + col < lk_total                 # (1, tk)

    for h in range(num_heads):    # static; per-head temporaries are only (tq, tk)
        lo = h * hd
        s = jnp.dot(q[:, lo:lo + hd].astype(compute_dtype), kt[lo:lo + hd, :],
                    preferred_element_type=jnp.float32)            # (tq, tk)
        if needs_mask:
            s = jnp.where(score_ok, s, -jnp.inf)
        m_prev = m_sc[h]
        m_new = jnp.maximum(m_prev, jnp.max(s, axis=-1, keepdims=True))
        alpha = jnp.exp(m_prev - m_new)
        p = jnp.exp(s - m_new)
        l_sc[h] = alpha * l_sc[h] + jnp.sum(p, axis=-1, keepdims=True)
        acc_sc[h] = alpha * acc_sc[h] + jnp.dot(
            p.astype(compute_dtype), v[:, lo:lo + hd],
            preferred_element_type=jnp.float32)
        m_sc[h] = m_new

    @pl.when(kv_i == pl.num_programs(2) - 1)
    def _finalize():
        # single full-E output projection (feedback: not num_heads K=hd matmuls)
        ctx = jnp.concatenate(
            [acc_sc[h] / l_sc[h] for h in range(num_heads)], axis=-1)   # (tq, E)
        attn = jnp.dot(ctx.astype(compute_dtype), wo_ref[...].astype(compute_dtype),
                       preferred_element_type=jnp.float32) + bo_ref[...]
        # residual (dropout == identity in eval) + LayerNorm
        x = qx_ref[0] + attn
        mu = jnp.mean(x, axis=-1, keepdims=True)
        xc = x - mu
        var = jnp.mean(xc * xc, axis=-1, keepdims=True)
        y = xc * lax.rsqrt(var + LN_EPS) * g_ref[...] + beta_ref[...]
        out_ref[0] = y.astype(out_ref.dtype)


def mha_ln_block(qx, q_in, kv, p, ln_g, ln_b, num_heads,
                 compute_dtype=DEFAULT_COMPUTE_DTYPE):
    """qx: residual stream (B,Lq,E); q_in: qx+pos (B,Lq,E); kv: key/value with
    pos already added (B,Lk,E)."""
    B, Lq, E = qx.shape
    Lk = kv.shape[1]
    assert E % num_heads == 0
    hd = E // num_heads
    tq = Lq if Lq <= 128 else 128
    tk = Lk if Lk <= 512 else 512
    nq = pl.cdiv(Lq, tq)
    nkv = pl.cdiv(Lk, tk)

    kern = functools.partial(mha_ln_kernel, num_heads=num_heads, lk_total=Lk,
                             block_k=tk, compute_dtype=compute_dtype)
    cost = pl.CostEstimate(
        flops=2 * B * (2 * Lq * E * E + 2 * Lk * E * E + 2 * Lq * Lk * E),
        transcendentals=B * num_heads * Lq * (Lk + nkv),
        bytes_accessed=4 * (B * (3 * Lq * E + Lk * E) + 4 * E * E + 8 * E))

    blk_q = pl.BlockSpec((1, tq, E), lambda b, qi, ki: (b, qi, 0))
    blk_kv = pl.BlockSpec((1, tk, E), lambda b, qi, ki: (b, ki, 0))

    return pl.pallas_call(
        kern,
        out_shape=jax.ShapeDtypeStruct((B, Lq, E), qx.dtype),
        grid_spec=pltpu.PrefetchScalarGridSpec(
            num_scalar_prefetch=0,
            grid=(B, nq, nkv),
            in_specs=[
                blk_q, blk_q, blk_kv,
                _replicated_spec(p["wq"]), _replicated_spec(p["bq"]),
                _replicated_spec(p["wkv"]), _replicated_spec(p["bkv"]),
                _replicated_spec(p["wo"]), _replicated_spec(p["bo"]),
                _replicated_spec(ln_g), _replicated_spec(ln_b),
            ],
            out_specs=pl.BlockSpec((1, tq, E), lambda b, qi, ki: (b, qi, 0)),
            scratch_shapes=[
                pltpu.VMEM((tq, E), jnp.float32),             # q projection
                pltpu.VMEM((num_heads, tq, 1), jnp.float32),  # running max
                pltpu.VMEM((num_heads, tq, 1), jnp.float32),  # running sum
                pltpu.VMEM((num_heads, tq, hd), jnp.float32),  # running context
            ],
        ),
        compiler_params=pltpu.CompilerParams(
            dimension_semantics=("parallel", "parallel", "arbitrary"),
            vmem_limit_bytes=48 * 1024 * 1024),
        cost_estimate=cost,
    )(qx, q_in, kv, p["wq"], p["bq"], p["wkv"], p["bkv"], p["wo"], p["bo"],
      ln_g, ln_b)


# ----------------------------------------------------------------------------
# Fused FFN sublayer: linear1 -> ReLU -> linear2 + residual + LayerNorm,
# row-tiled over the flattened (B*Lq) dimension.
# ----------------------------------------------------------------------------
def ffn_ln_kernel(x_ref, w1_ref, b1_ref, w2_ref, b2_ref, g_ref, beta_ref,
                  out_ref, *, compute_dtype):
    x = x_ref[...]
    h = jnp.maximum(
        jnp.dot(x.astype(compute_dtype), w1_ref[...].astype(compute_dtype),
                preferred_element_type=jnp.float32) + b1_ref[...], 0.0)
    y = jnp.dot(h.astype(compute_dtype), w2_ref[...].astype(compute_dtype),
                preferred_element_type=jnp.float32) + b2_ref[...]
    z = x + y
    mu = jnp.mean(z, axis=-1, keepdims=True)
    zc = z - mu
    var = jnp.mean(zc * zc, axis=-1, keepdims=True)
    out = zc * lax.rsqrt(var + LN_EPS) * g_ref[...] + beta_ref[...]
    out_ref[...] = out.astype(out_ref.dtype)


def ffn_ln_block(x, ffn, ln_g, ln_b, compute_dtype=DEFAULT_COMPUTE_DTYPE):
    B, Lq, E = x.shape
    Fff = ffn["w1"].shape[1]
    M = B * Lq
    xf = x.reshape(M, E)
    tm = _row_tile(M)
    cost = pl.CostEstimate(
        flops=4 * M * E * Fff, transcendentals=0,
        bytes_accessed=4 * (2 * M * E + 2 * E * Fff + Fff + 3 * E))
    kern = functools.partial(ffn_ln_kernel, compute_dtype=compute_dtype)
    out = pl.pallas_call(
        kern,
        out_shape=jax.ShapeDtypeStruct((M, E), x.dtype),
        grid_spec=pltpu.PrefetchScalarGridSpec(
            num_scalar_prefetch=0,
            grid=(pl.cdiv(M, tm),),
            in_specs=[
                pl.BlockSpec((tm, E), lambda i: (i, 0)),
                _replicated_spec(ffn["w1"]), _replicated_spec(ffn["b1"]),
                _replicated_spec(ffn["w2"]), _replicated_spec(ffn["b2"]),
                _replicated_spec(ln_g), _replicated_spec(ln_b),
            ],
            out_specs=pl.BlockSpec((tm, E), lambda i: (i, 0)),
        ),
        compiler_params=pltpu.CompilerParams(
            dimension_semantics=("parallel",),
            vmem_limit_bytes=32 * 1024 * 1024),
        cost_estimate=cost,
    )(xf, ffn["w1"], ffn["b1"], ffn["w2"], ffn["b2"], ln_g, ln_b)
    return out.reshape(B, Lq, E)


# ----------------------------------------------------------------------------
# Full decoder layer
# ----------------------------------------------------------------------------
def transformer_decoder_layer(query, key, query_pos, key_pos, kparams, num_heads,
                              compute_dtype=DEFAULT_COMPUTE_DTYPE):
    """query: (B, d_model, Pq), key: (B, d_model, Pk),
    query_pos: (B, Pq, pos_dim), key_pos: (B, Pk, pos_dim) -> (B, d_model, Pq)."""
    # channels-last internal layout (d_model on TPU lanes); mirrors the
    # module's own `.permute(2, 0, 1)`.
    q_seq = jnp.transpose(query, (0, 2, 1))     # (B, Pq, E)
    k_seq = jnp.transpose(key, (0, 2, 1))       # (B, Pk, E)

    qpe = pos_embed(query_pos, kparams["self_pos"], compute_dtype)        # (B,Pq,E)
    # key + key_pos_embed fused in one pass -> single kv stream for cross-attn
    kv_in = pos_embed_add(key_pos, k_seq, kparams["cross_pos"], compute_dtype)

    q_with_pos = q_seq + qpe        # tiny (B, Pq, E) add, left to XLA

    # self-attention + LayerNorm1  (q = k = v = query + query_pos_embed)
    q1 = mha_ln_block(q_seq, q_with_pos, q_with_pos, kparams["self_attn"],
                      kparams["ln1_g"], kparams["ln1_b"], num_heads, compute_dtype)
    # cross-attention + LayerNorm2 (k = v = key + key_pos_embed, pre-fused)
    q2 = mha_ln_block(q1, q1 + qpe, kv_in, kparams["cross_attn"],
                      kparams["ln2_g"], kparams["ln2_b"], num_heads, compute_dtype)
    # FFN + LayerNorm3
    q3 = ffn_ln_block(q2, kparams["ffn"], kparams["ln3_g"], kparams["ln3_b"],
                      compute_dtype)

    # Back to the PyTorch (B, d_model, Pq) contract (tiny tensor).
    return jnp.transpose(q3, (0, 2, 1))


# ----------------------------------------------------------------------------
# Parameters (canonical), kernel-side prep (folds), pure-JAX reference
# ----------------------------------------------------------------------------
def init_params(key, d_model, dim_ff, pos_dim, dtype=jnp.float32):
    keys = iter(jax.random.split(key, 64))

    def nrm(shape, s):
        return s * jax.random.normal(next(keys), shape, dtype)

    def pos_params():
        return {"w1": nrm((pos_dim, d_model), 0.5), "b1": nrm((1, d_model), 0.1),
                "gamma": 1.0 + nrm((1, d_model), 0.1), "beta": nrm((1, d_model), 0.1),
                "mean": nrm((1, d_model), 0.1),
                "var": 1.0 + 0.1 * jnp.abs(nrm((1, d_model), 1.0)),
                "w2": nrm((d_model, d_model), 0.2), "b2": nrm((1, d_model), 0.1)}

    def attn_params():
        return {"wq": nrm((d_model, d_model), 0.2), "bq": nrm((1, d_model), 0.05),
                "wk": nrm((d_model, d_model), 0.2), "bk": nrm((1, d_model), 0.05),
                "wv": nrm((d_model, d_model), 0.2), "bv": nrm((1, d_model), 0.05),
                "wo": nrm((d_model, d_model), 0.2), "bo": nrm((1, d_model), 0.05)}

    return {
        "self_pos": pos_params(), "cross_pos": pos_params(),
        "self_attn": attn_params(), "cross_attn": attn_params(),
        "ffn": {"w1": nrm((d_model, dim_ff), 0.2), "b1": nrm((1, dim_ff), 0.05),
                "w2": nrm((dim_ff, d_model), 0.2), "b2": nrm((1, d_model), 0.05)},
        "ln1_g": 1.0 + nrm((1, d_model), 0.1), "ln1_b": nrm((1, d_model), 0.1),
        "ln2_g": 1.0 + nrm((1, d_model), 0.1), "ln2_b": nrm((1, d_model), 0.1),
        "ln3_g": 1.0 + nrm((1, d_model), 0.1), "ln3_b": nrm((1, d_model), 0.1),
    }


def prepare_params(params, num_heads):
    """Param-prep folds: BN+bias into pos-MLP w1f/b1f, 1/sqrt(hd) into wq/bq,
    wk|wv concatenated into one (E, 2E) weight."""
    E = params["self_attn"]["wq"].shape[0]
    scale = float((E // num_heads) ** -0.5)

    def prep_pos(p):
        s = p["gamma"] * lax.rsqrt(p["var"] + BN_EPS)
        return {"w1f": p["w1"] * s, "b1f": (p["b1"] - p["mean"]) * s + p["beta"],
                "w2": p["w2"], "b2": p["b2"]}

    def prep_attn(p):
        return {"wq": p["wq"] * scale, "bq": p["bq"] * scale,
                "wkv": jnp.concatenate([p["wk"], p["wv"]], axis=1),
                "bkv": jnp.concatenate([p["bk"], p["bv"]], axis=1),
                "wo": p["wo"], "bo": p["bo"]}

    out = {"self_pos": prep_pos(params["self_pos"]),
           "cross_pos": prep_pos(params["cross_pos"]),
           "self_attn": prep_attn(params["self_attn"]),
           "cross_attn": prep_attn(params["cross_attn"]),
           "ffn": params["ffn"]}
    for k in ("ln1_g", "ln1_b", "ln2_g", "ln2_b", "ln3_g", "ln3_b"):
        out[k] = params[k]
    return out


def reference(query, key, query_pos, key_pos, params, num_heads):
    B, E, _ = query.shape

    def mm(a, b):
        return jnp.matmul(a, b, precision=_HIGH)

    def pos_mlp(x, p):
        h = mm(x, p["w1"]) + p["b1"]
        h = (h - p["mean"]) * lax.rsqrt(p["var"] + BN_EPS) * p["gamma"] + p["beta"]
        return mm(jnp.maximum(h, 0.0), p["w2"]) + p["b2"]

    def ln(x, g, b):
        mu = jnp.mean(x, -1, keepdims=True)
        var = jnp.mean((x - mu) ** 2, -1, keepdims=True)
        return (x - mu) * lax.rsqrt(var + LN_EPS) * g + b

    def mha(qx, qpos, kvx, kvpos, p):
        hd = E // num_heads
        q = (mm(qx + qpos, p["wq"]) + p["bq"]) * (hd ** -0.5)
        k = mm(kvx + kvpos, p["wk"]) + p["bk"]
        v = mm(kvx + kvpos, p["wv"]) + p["bv"]
        split = lambda t: t.reshape(B, -1, num_heads, hd).transpose(0, 2, 1, 3)
        qh, kh, vh = split(q), split(k), split(v)
        s = jnp.einsum("bhqd,bhkd->bhqk", qh, kh, precision=_HIGH)
        w = jax.nn.softmax(s, axis=-1)
        ctx = jnp.einsum("bhqk,bhkd->bhqd", w, vh, precision=_HIGH)
        ctx = ctx.transpose(0, 2, 1, 3).reshape(B, -1, E)
        return mm(ctx, p["wo"]) + p["bo"]

    q_seq = jnp.transpose(query, (0, 2, 1))
    k_seq = jnp.transpose(key, (0, 2, 1))
    qpe = pos_mlp(query_pos, params["self_pos"])
    kpe = pos_mlp(key_pos, params["cross_pos"])
    q1 = ln(q_seq + mha(q_seq, qpe, q_seq, qpe, params["self_attn"]),
            params["ln1_g"], params["ln1_b"])
    q2 = ln(q1 + mha(q1, qpe, k_seq, kpe, params["cross_attn"]),
            params["ln2_g"], params["ln2_b"])
    ff = mm(jnp.maximum(mm(q2, params["ffn"]["w1"]) + params["ffn"]["b1"], 0.0),
            params["ffn"]["w2"]) + params["ffn"]["b2"]
    q3 = ln(q2 + ff, params["ln3_g"], params["ln3_b"])
    return jnp.transpose(q3, (0, 2, 1))


if __name__ == "__main__":
    # Small shapes, but Pk > kv-tile (512) so the online-softmax multi-tile
    # path and the partial-last-tile masking are both exercised.
    B, d_model, nhead, Pq, Pk, dim_ff, pos_dim = 2, 32, 4, 8, 640, 64, 2
    root = jax.random.PRNGKey(0)
    k_q, k_k, k_qp, k_kp, k_par = jax.random.split(root, 5)
    query = jax.random.normal(k_q, (B, d_model, Pq), jnp.float32)
    key_feat = jax.random.normal(k_k, (B, d_model, Pk), jnp.float32)
    query_pos = jax.random.normal(k_qp, (B, Pq, pos_dim), jnp.float32)
    key_pos = jax.random.normal(k_kp, (B, Pk, pos_dim), jnp.float32)

    params = init_params(k_par, d_model, dim_ff, pos_dim)
    kparams = prepare_params(params, nhead)

    out = transformer_decoder_layer(query, key_feat, query_pos, key_pos,
                                    kparams, num_heads=nhead)
    out = jax.block_until_ready(out)

    ref = reference(query, key_feat, query_pos, key_pos, params, num_heads=nhead)
    assert out.shape == (B, d_model, Pq)
    assert jnp.allclose(out, ref, atol=2e-3, rtol=2e-3), \
        float(jnp.max(jnp.abs(out - ref)))
    print("KERNEL_OK")
</pallas_src>

<mosaic_0001>
module attributes {stable_mosaic.version = 11 : i64} {
  func.func @pos_mlp_kernel(%arg0: i32, %arg1: memref<16x2xf32, #tpu.memory_space<vmem>>, %arg2: memref<2x32xf32, #tpu.memory_space<vmem>>, %arg3: memref<1x32xf32, #tpu.memory_space<vmem>>, %arg4: memref<32x32xf32, #tpu.memory_space<vmem>>, %arg5: memref<1x32xf32, #tpu.memory_space<vmem>>, %arg6: memref<16x32xf32, #tpu.memory_space<vmem>>) attributes {dimension_semantics = [#tpu.dimension_semantics<parallel>], iteration_bounds = array<i64: 1>, scalar_prefetch = 0 : i64, scratch_operands = 0 : i64, tpu.core_type = #tpu.core_type<tc>, window_params = [{transform_indices = @transform_0, window_bounds = array<i64: 16, 2>}, {pipeline_mode = #tpu.pipeline_mode<synchronous>, transform_indices = @transform_1, window_bounds = array<i64: 2, 32>}, {pipeline_mode = #tpu.pipeline_mode<synchronous>, transform_indices = @transform_2, window_bounds = array<i64: 1, 32>}, {pipeline_mode = #tpu.pipeline_mode<synchronous>, transform_indices = @transform_3, window_bounds = array<i64: 32, 32>}, {pipeline_mode = #tpu.pipeline_mode<synchronous>, transform_indices = @transform_4, window_bounds = array<i64: 1, 32>}, {transform_indices = @transform_5, window_bounds = array<i64: 16, 32>}]} {
    %c0 = arith.constant 0 : index
    %c0_0 = arith.constant 0 : index
    %0 = vector.load %arg1[%c0, %c0_0] : memref<16x2xf32, #tpu.memory_space<vmem>>, vector<16x2xf32>
    %c0_1 = arith.constant 0 : index
    %c0_2 = arith.constant 0 : index
    %1 = vector.load %arg2[%c0_1, %c0_2] : memref<2x32xf32, #tpu.memory_space<vmem>>, vector<2x32xf32>
    %c0_3 = arith.constant 0 : index
    %c0_4 = arith.constant 0 : index
    %2 = vector.load %arg3[%c0_3, %c0_4] : memref<1x32xf32, #tpu.memory_space<vmem>>, vector<1x32xf32>
    %c0_5 = arith.constant 0 : index
    %c0_6 = arith.constant 0 : index
    %3 = vector.load %arg4[%c0_5, %c0_6] : memref<32x32xf32, #tpu.memory_space<vmem>>, vector<32x32xf32>
    %c0_7 = arith.constant 0 : index
    %c0_8 = arith.constant 0 : index
    %4 = vector.load %arg5[%c0_7, %c0_8] : memref<1x32xf32, #tpu.memory_space<vmem>>, vector<1x32xf32>
    %cst = arith.constant dense<0.000000e+00> : vector<16x32xf32>
    %5 = tpu.matmul %0, %1, %cst {dimension_numbers = #tpu.dot_dimension_numbers<[1], [0], [0], [1], [0, 0, 1, 1], [], []>} : vector<16x2xf32>, vector<2x32xf32>, vector<16x32xf32> -> vector<16x32xf32>
    %6 = vector.broadcast %2 : vector<1x32xf32> to vector<16x32xf32>
    %7 = arith.addf %5, %6 : vector<16x32xf32>
    %cst_9 = arith.constant 0.000000e+00 : f32
    %8 = vector.broadcast %cst_9 : f32 to vector<16x32xf32>
    %9 = arith.maximumf %7, %8 : vector<16x32xf32>
    %cst_10 = arith.constant dense<0.000000e+00> : vector<16x32xf32>
    %10 = tpu.matmul %9, %3, %cst_10 {dimension_numbers = #tpu.dot_dimension_numbers<[1], [0], [0], [1], [0, 0, 1, 1], [], []>} : vector<16x32xf32>, vector<32x32xf32>, vector<16x32xf32> -> vector<16x32xf32>
    %11 = vector.broadcast %4 : vector<1x32xf32> to vector<16x32xf32>
    %12 = arith.addf %10, %11 : vector<16x32xf32>
    %c0_11 = arith.constant 0 : index
    %c0_12 = arith.constant 0 : index
    %13 = vector.load %arg6[%c0_11, %c0_12] : memref<16x32xf32, #tpu.memory_space<vmem>>, vector<16x32xf32>
    tpu.vector_store %arg6[%c0_11, %c0_12], %12 {strides = array<i32>} : memref<16x32xf32, #tpu.memory_space<vmem>>, vector<16x32xf32>,
    return
  }
  func.func @transform_0(%arg0: i32) -> (i32, i32) {
    %c0_i32 = arith.constant 0 : i32
    %c0_i32_0 = arith.constant 0 : i32
    return %arg0, %c0_i32 : i32, i32
  }
  func.func @transform_1(%arg0: i32) -> (i32, i32) {
    %c0_i32 = arith.constant 0 : i32
    %c0_i32_0 = arith.constant 0 : i32
    %c0_i32_1 = arith.constant 0 : i32
    return %c0_i32, %c0_i32_0 : i32, i32
  }
  func.func @transform_2(%arg0: i32) -> (i32, i32) {
    %c0_i32 = arith.constant 0 : i32
    %c0_i32_0 = arith.constant 0 : i32
    %c0_i32_1 = arith.constant 0 : i32
    return %c0_i32, %c0_i32_0 : i32, i32
  }
  func.func @transform_3(%arg0: i32) -> (i32, i32) {
    %c0_i32 = arith.constant 0 : i32
    %c0_i32_0 = arith.constant 0 : i32
    %c0_i32_1 = arith.constant 0 : i32
    return %c0_i32, %c0_i32_0 : i32, i32
  }
  func.func @transform_4(%arg0: i32) -> (i32, i32) {
    %c0_i32 = arith.constant 0 : i32
    %c0_i32_0 = arith.constant 0 : i32
    %c0_i32_1 = arith.constant 0 : i32
    return %c0_i32, %c0_i32_0 : i32, i32
  }
  func.func @transform_5(%arg0: i32) -> (i32, i32) {
    %c0_i32 = arith.constant 0 : i32
    %c0_i32_0 = arith.constant 0 : i32
    return %arg0, %c0_i32 : i32, i32
  }
}

</mosaic_0001>

<bundles_post_ra>
// kernel: tpu_custom_call.1
= control target key start
LH: loop header
LB: loop body
LE: loop exit
PB: predicated region body
PF: predicated region fallthrough
CT: control target
= control target key end

     0   :  { %10 = vsyncpa [#allocation3], 0  ;;  %s416_s0 = inlined_call_operand.vmem [shape: f32[16,2], index: 0, kind: input, shape index: {}]   ;;  %s417_s1 = inlined_call_operand.vmem [shape: f32[2,32], index: 1, kind: input, shape index: {}]   ;;  %s418_s2 = inlined_call_operand.vmem [shape: f32[1,32], index: 2, kind: input, shape index: {}]   ;;  %s419_s3 = inlined_call_operand.hbm [shape: f32[32,32], index: 3, kind: input, shape index: {}]   ;;  %s420_s4 = inlined_call_operand.vmem [shape: f32[1,32], index: 4, kind: input, shape index: {}]   ;;  %s421_s5 = inlined_call_operand.hbm [shape: f32[16,32], index: 5, kind: output, shape index: {}]  }
   0x1   :  { %11 = vsyncpa [#allocation4], 0  ;;  %s337_s18 = smov [#allocation2]   ;;  %s289_s22 = scalar_lea.hbm %s419_s3, 512 }
   0x2   :  { %s23_s19 = sshll.u32 %s337_s18, 4  ;;  %p290_p0 = scmp.ne.s32.totalorder %s419_s3, %s289_s22  ;;  %s24_s19 = int_to_ptr.vmem [resolvable:$true] %s23_s19 }
   0x3   :  { %p293_p1 = scmp.lt.u32.totalorder %s289_s22, %s419_s3 }
   0x5   :  { %p295_p2 = pnand %p293_p1, %p290_p0 }
   0x7   :  { %298 = shalt.err (!%p295_p2)
}
   0x8   :  { %s299_s27 = scalar_lea.vmem %s24_s19, 512  ;;  %p304_p4 = scmp.lt.s32.totalorder %s24_s19, %s24_s19 }
   0x9   :  { %p300_p3 = scmp.ne.s32.totalorder %s24_s19, %s299_s27  ;;  %p305_p5 = scmp.lt.s32.totalorder %s299_s27, %s299_s27 }
   0xb   :  { %p306_p6 = por %p305_p5, %p304_p4 }
   0xd   :  { %p307_p7 = pnand %p306_p6, %p300_p3 }
   0xf   :  { %310 = shalt.err (!%p307_p7)
}
  0x10   :  { %s338_s28 = smov 128   ;;  %s339_s29 = smov 8  }
  0x11   :  { %29 = dma.hbm_to_vmem [thread:$0]  %s419_s3, 512, %s24_s19, [#allocation3], %s338_s28, %s338_s28, %s339_s29  }
  0x12   :  { %333 = dma.done.wait [#allocation3], 512  }
  0x13   :  { %334 = vsyncadd [#allocation3], 4294966784  ;;  %vm57_vm0 = vcmask 1041408   ;;  %vm50_vm1 = vcmask 15360   ;;  %v37_v0 = vld [vmem:[%s417_s1] sm:$0x3] }
  0x14   :  { %v35_v1 = vld [vmem:[%s416_s0] sm:$0xff]  ;;  %v36_v2 = vld [vmem:[%s416_s0 + $0x8] sm:$0xff]  ;;  %261 = vmatprep.subr.msk.mxu0 %vm57_vm0, %v37_v0  ;;  %v41_v6 = vld [vmem:[#allocation2 + $0x10] sm:$0xff]  ;;  %vm144_vm2 = vcmask 261120   ;;  %s340_s14 = smov [#allocation5]  }
  0x15   :  { %263 = vmatprep.mubr.msk.f32.mxu0 %vm50_vm1, %v35_v1  ;;  %v39_v3 = vld [vmem:[#allocation2] sm:$0xff]  ;;  %v40_v4 = vld [vmem:[#allocation2 + $0x8] sm:$0xff]  ;;  %262 = vmatpush3.msk.msra.mxu0 %vm57_vm0, %v37_v0  ;;  %v42_v7 = vld [vmem:[#allocation2 + $0x18] sm:$0xff]  ;;  %s233_s15 = sshll.u32 %s340_s14, 4  ;;  %s234_s15 = int_to_ptr.vmem [resolvable:$true] %s233_s15 }
  0x16   :  { %v277_v5 = vpack.c.bf16 %v40_v4, %v39_v3  ;;  %264 = vmatmul.mubr.msk.f32.vlgmr.msra.gmra.mrb[0].mxu0 %vm50_vm1, %v36_v2  ;;  %v281_v8 = vpack.c.bf16 %v42_v7, %v41_v6  ;;  %v245_v9 = vld [vmem:[%s418_s2] ss:$0 sm:$0xff]  ;;  %s311_s2 = scalar_lea.vmem %s234_s15, 256  ;;  %p316_p9 = scmp.lt.s32.totalorder %s234_s15, %s234_s15 }
  0x17   :  { %v249_v16 = vld [vmem:[%s420_s4] ss:$0 sm:$0xff]  ;;  %p312_p8 = scmp.ne.s32.totalorder %s234_s15, %s311_s2  ;;  %p317_p10 = scmp.lt.s32.totalorder %s311_s2, %s311_s2 }
  0x18   :  { %278 = vmatprep.subr.bf16.mxu1 %v277_v5 }
  0x19   :  { %280 = vmatpush3.bf16.msra.mxu1 %v277_v5  ;;  %p318_p11 = por %p317_p10, %p316_p9 }
  0x1a   :  { %282 = vmatprep.subr.bf16.mxu1 %v281_v8 }
  0x1b   :  { %p319_p12 = pnand %p318_p11, %p312_p8 }
  0x1d   :  { %284 = vmatpush3.bf16.msra.mxu1 %v281_v8 }
  0xe9   :  { %v265_v10 = vpop.f32.mrb[0].mxu0 }
  0xea   :  { %v133_v11 = vadd.f32 %v265_v10, %v245_v9  ;;  %v127_v12 = vpop.f32.mrb[1].mxu0 }
  0xeb   :  { %v128_v13 = vadd.f32 %v245_v9, %v127_v12 }
  0xec   :  { %v137_v15 = vmax.f32 %v133_v11, 0.0 }
  0xed   :  { %v136_v14 = vmax.f32 %v128_v13, 0.0 }
  0xef   :  { %274 = vmatprep.mubr.msk.f32.mxu1 %vm144_vm2, %v136_v14 }
  0xf0   :  { %275 = vmatmul.mubr.msk.f32.vlgmr.msra.gmra.mrb[0].mxu1 %vm144_vm2, %v137_v15 }
 0x1c3   :  { %v276_v17 = vpop.f32.mrb[0].mxu1 }
 0x1c4   :  { %v223_v18 = vadd.f32 %v276_v17, %v249_v16  ;;  %v217_v19 = vpop.f32.mrb[1].mxu1 }
 0x1c5   :  { %v218_v20 = vadd.f32 %v249_v16, %v217_v19 }
 0x1c6   :  { %227 = vst.msk [vmem:[#allocation5 + $0x8] sm:$0xff] %vm144_vm2, %v223_v18 }
 0x1c7   :  { %226 = vst.msk [vmem:[#allocation5] sm:$0xff] %vm144_vm2, %v218_v20 }
 0x1c8   :  { %322 = shalt.err (!%p319_p12)
}
 0x1c9   :  { %s323_s4 = scalar_lea.hbm %s421_s5, 256 }
 0x1ca   :  { %p324_p13 = scmp.ne.s32.totalorder %s421_s5, %s323_s4  ;;  %p327_p0 = scmp.lt.u32.totalorder %s323_s4, %s421_s5 }
 0x1cc   :  { %p329_p1 = pnand %p327_p0, %p324_p13 }
 0x1ce   :  { %332 = shalt.err (!%p329_p1)
}
 0x1cf   :  { %239 = dma.vmem_to_hbm [thread:$0]  %s234_s15, 256, %s421_s5, [#allocation4], %s338_s28, %s338_s28, %s339_s29  }
 0x1d0   :  { %335 = dma.done.wait [#allocation4], 256  }
 0x1d1   :  { %336 = vsyncadd [#allocation4], 4294967040 }
 0x1d2   :  { %243 = vsyncpa [#allocation3], 1 }
 0x1d3   :  { %244 = vsyncpa [#allocation4], 1 }

</bundles_post_ra>
